<compile_context>
chip_gen: v5e
topology: v5e:2x2
jax: 0.10.0
libtpu: 0.0.40
codegen_flags: <defaults>
</compile_context>

<pallas_src>
import functools

import jax
import jax.numpy as jnp
from jax import lax
from jax.experimental import pallas as pl
from jax.experimental.pallas import tpu as pltpu


# ---------------------------------------------------------------------------
# Tile-size helpers (respect the (8, 128) block constraints).
# ---------------------------------------------------------------------------
def _pick_sublane_tile(dim, target):
    """Tile for a second-to-last block dim: multiple of 8 dividing dim, else full."""
    t = min(target, dim)
    t -= t % 8
    while t >= 8:
        if dim % t == 0:
            return t
        t -= 8
    return dim


def _pick_lane_tile(dim, target):
    """Tile for a last block dim: multiple of 128 dividing dim, else full."""
    t = min(target, dim)
    t -= t % 128
    while t >= 128:
        if dim % t == 0:
            return t
        t -= 128
    return dim


def _pick_divisor(n, target):
    t = min(target, n)
    while t > 1:
        if n % t == 0:
            return t
        t -= 1
    return 1


# ---------------------------------------------------------------------------
# Kernel 1: tiled dense linear layer  y = x @ w + b
#   x: (M, K)   w: (K, N)   b: (1, N)   y: (M, N)
#   grid = (M//tm, N//tn, K//tk); f32 accumulator persists across the K axis.
# ---------------------------------------------------------------------------
def _linear_kernel(x_ref, w_ref, b_ref, o_ref, acc_ref):
    k = pl.program_id(2)

    @pl.when(k == 0)
    def _():
        acc_ref[...] = jnp.zeros_like(acc_ref)

    acc_ref[...] += jnp.dot(x_ref[...], w_ref[...],
                            preferred_element_type=jnp.float32)

    @pl.when(k == pl.num_programs(2) - 1)
    def _():
        o_ref[...] = (acc_ref[...] + b_ref[...]).astype(o_ref.dtype)


def linear(x, w, b, *, tm_target=512, tn_target=256, tk_target=512):
    m, kdim = x.shape
    n = w.shape[1]
    tm = _pick_sublane_tile(m, tm_target)
    tn = _pick_lane_tile(n, tn_target)
    tk = _pick_lane_tile(kdim, tk_target)
    grid = (m // tm, n // tn, kdim // tk)
    return pl.pallas_call(
        _linear_kernel,
        out_shape=jax.ShapeDtypeStruct((m, n), x.dtype),
        grid=grid,
        in_specs=[
            pl.BlockSpec((tm, tk), lambda i, j, k: (i, k)),
            pl.BlockSpec((tk, tn), lambda i, j, k: (k, j)),
            pl.BlockSpec((1, tn), lambda i, j, k: (0, j)),
        ],
        out_specs=pl.BlockSpec((tm, tn), lambda i, j, k: (i, j)),
        scratch_shapes=[pltpu.VMEM((tm, tn), jnp.float32)],
        compiler_params=pltpu.CompilerParams(
            dimension_semantics=("parallel", "parallel", "arbitrary")),
    )(x, w, b.reshape(1, n))


# ---------------------------------------------------------------------------
# Kernel 2: head-batched attention
#   q, k, v: (BH, S, Dh)  ->  out: (BH, S, Dh) [, attn: (BH, S, S)]
#   grid = (BH//Hb, S//tq); K/V tiles are indexed only by the head-block axis
#   so they stay resident while the (faster) q axis iterates.
# ---------------------------------------------------------------------------
def _attn_kernel(q_ref, k_ref, v_ref, o_ref, attn_ref=None, *, scale):
    q = q_ref[...].astype(jnp.float32) * scale            # (Hb, tq, Dh)
    kk = k_ref[...].astype(jnp.float32)                   # (Hb, S, Dh)
    v = v_ref[...].astype(jnp.float32)                    # (Hb, S, Dh)

    # (Hb, tq, S): contract the trailing Dh of q and k directly (no k.T relayout).
    s = lax.dot_general(q, kk, (((2,), (2,)), ((0,), (0,))),
                        preferred_element_type=jnp.float32)
    m = jnp.max(s, axis=-1, keepdims=True)
    p = jnp.exp(s - m)
    denom = jnp.sum(p, axis=-1, keepdims=True)
    p = p * pl.reciprocal(denom, approx=True)              # EUP slot, ~free

    if attn_ref is not None:
        attn_ref[...] = p.astype(attn_ref.dtype)

    o = lax.dot_general(p, v, (((2,), (1,)), ((0,), (0,))),
                        preferred_element_type=jnp.float32)
    o_ref[...] = o.astype(o_ref.dtype)


def multihead_attention(q, k, v, scale, *, heads_per_block=8,
                        q_block_target=256, return_attn=True):
    bh, s, dh = q.shape
    hb = _pick_divisor(bh, heads_per_block)
    tq = _pick_sublane_tile(s, q_block_target)
    grid = (bh // hb, s // tq)

    kern = functools.partial(_attn_kernel, scale=scale)

    in_specs = [
        pl.BlockSpec((hb, tq, dh), lambda h, i: (h, i, 0)),
        pl.BlockSpec((hb, s, dh), lambda h, i: (h, 0, 0)),
        pl.BlockSpec((hb, s, dh), lambda h, i: (h, 0, 0)),
    ]
    out_spec_o = pl.BlockSpec((hb, tq, dh), lambda h, i: (h, i, 0))

    if return_attn:
        out_shape = (
            jax.ShapeDtypeStruct((bh, s, dh), q.dtype),
            jax.ShapeDtypeStruct((bh, s, s), q.dtype),
        )
        out_specs = (
            out_spec_o,
            pl.BlockSpec((hb, tq, s), lambda h, i: (h, i, 0)),
        )
    else:
        out_shape = jax.ShapeDtypeStruct((bh, s, dh), q.dtype)
        out_specs = out_spec_o

    return pl.pallas_call(
        kern,
        out_shape=out_shape,
        grid=grid,
        in_specs=in_specs,
        out_specs=out_specs,
        compiler_params=pltpu.CompilerParams(
            dimension_semantics=("parallel", "parallel")),
    )(q, k, v)


# ---------------------------------------------------------------------------
# Full module forward (glue in plain JAX, hot paths in Pallas)
# ---------------------------------------------------------------------------
def attention_forward(x, params, num_heads, *, return_attn=True):
    B, H, W, dim = x.shape
    S = H * W
    head_dim = dim // num_heads
    scale = head_dim ** (-0.5)

    # qkv projection: (B*S, dim) @ (dim, 3*dim) + bias
    qkv = linear(x.reshape(B * S, dim), params["w_qkv"], params["b_qkv"])

    # reshape exactly like the torch code:
    # (B, S, 3, nh, hd) -> permute(2,0,3,1,4) -> (3, B*nh, S, hd)
    qkv = qkv.reshape(B, S, 3, num_heads, head_dim)
    qkv = jnp.transpose(qkv, (2, 0, 3, 1, 4)).reshape(3, B * num_heads, S, head_dim)
    q, k, v = qkv[0], qkv[1], qkv[2]

    res = multihead_attention(q, k, v, scale, return_attn=return_attn)
    if return_attn:
        out_h, attn = res
    else:
        out_h, attn = res, None

    # (B, nh, H, W, hd) -> permute(0,2,3,1,4) -> (B, H, W, dim)
    out = out_h.reshape(B, num_heads, H, W, head_dim)
    out = jnp.transpose(out, (0, 2, 3, 1, 4)).reshape(B, H, W, dim)

    # output projection
    out = linear(out.reshape(B * S, dim), params["w_proj"], params["b_proj"])
    out = out.reshape(B, H, W, dim)
    return out, attn


# ---------------------------------------------------------------------------
# Pure-JAX reference for a correctness check
# ---------------------------------------------------------------------------
def attention_reference(x, params, num_heads):
    B, H, W, dim = x.shape
    S = H * W
    head_dim = dim // num_heads
    scale = head_dim ** (-0.5)
    qkv = x.reshape(B * S, dim) @ params["w_qkv"] + params["b_qkv"]
    qkv = qkv.reshape(B, S, 3, num_heads, head_dim)
    qkv = jnp.transpose(qkv, (2, 0, 3, 1, 4)).reshape(3, B * num_heads, S, head_dim)
    q, k, v = qkv[0], qkv[1], qkv[2]
    attn = (q * scale) @ jnp.swapaxes(k, -2, -1)
    attn = jax.nn.softmax(attn, axis=-1)
    out = attn @ v
    out = out.reshape(B, num_heads, H, W, head_dim)
    out = jnp.transpose(out, (0, 2, 3, 1, 4)).reshape(B, H, W, dim)
    out = out.reshape(B * S, dim) @ params["w_proj"] + params["b_proj"]
    return out.reshape(B, H, W, dim), attn


if __name__ == "__main__":
    # Small shapes consistent with the module's forward: x is (B, H, W, dim)
    B, H, W = 2, 4, 4
    dim, num_heads = 64, 8

    key = jax.random.PRNGKey(0)
    kx, kq, kbq, kp, kbp = jax.random.split(key, 5)

    x = jax.random.normal(kx, (B, H, W, dim), dtype=jnp.float32)

    # PyTorch nn.Linear(dim, 3*dim) weight is (3*dim, dim); we store the
    # transposed (dim, 3*dim), ready for x @ w.
    params = {
        "w_qkv": 0.02 * jax.random.normal(kq, (dim, 3 * dim), dtype=jnp.float32),
        "b_qkv": 0.01 * jax.random.normal(kbq, (3 * dim,), dtype=jnp.float32),
        "w_proj": 0.02 * jax.random.normal(kp, (dim, dim), dtype=jnp.float32),
        "b_proj": 0.01 * jax.random.normal(kbp, (dim,), dtype=jnp.float32),
    }

    out, attn = attention_forward(x, params, num_heads)
    out = jax.block_until_ready(out)
    attn = jax.block_until_ready(attn)

    ref_out, ref_attn = attention_reference(x, params, num_heads)
    assert out.shape == (B, H, W, dim)
    assert attn.shape == (B * num_heads, H * W, H * W)
    # Tolerance slightly loosened vs f32-exact because the softmax denominator
    # uses the EUP approximate reciprocal.
    assert jnp.allclose(out, ref_out, atol=1e-3, rtol=1e-3)
    assert jnp.allclose(attn, ref_attn, atol=1e-3, rtol=1e-3)

    print("KERNEL_OK")
</pallas_src>

<mosaic_0001>
module attributes {stable_mosaic.version = 11 : i64} {
  func.func @_linear_kernel(%arg0: i32, %arg1: i32, %arg2: i32, %arg3: memref<32x64xf32, #tpu.memory_space<vmem>>, %arg4: memref<64x192xf32, #tpu.memory_space<vmem>>, %arg5: memref<1x192xf32, #tpu.memory_space<vmem>>, %arg6: memref<32x192xf32, #tpu.memory_space<vmem>>, %arg7: memref<32x192xf32, #tpu.memory_space<vmem>>) attributes {dimension_semantics = [#tpu.dimension_semantics<parallel>, #tpu.dimension_semantics<parallel>, #tpu.dimension_semantics<arbitrary>], iteration_bounds = array<i64: 1, 1, 1>, scalar_prefetch = 0 : i64, scratch_operands = 1 : i64, tpu.core_type = #tpu.core_type<tc>, window_params = [{transform_indices = @transform_0, window_bounds = array<i64: 32, 64>}, {transform_indices = @transform_1, window_bounds = array<i64: 64, 192>}, {transform_indices = @transform_2, window_bounds = array<i64: 1, 192>}, {transform_indices = @transform_3, window_bounds = array<i64: 32, 192>}]} {
    %c0_i32 = arith.constant 0 : i32
    %0 = arith.cmpi eq, %arg2, %c0_i32 : i32
    %1 = arith.extui %0 : i1 to i32
    %c0_i32_0 = arith.constant 0 : i32
    %2 = arith.cmpi ne, %1, %c0_i32_0 : i32
    scf.if %2 {
      %cst_10 = arith.constant 0.000000e+00 : f32
      %12 = vector.broadcast %cst_10 : f32 to vector<32x192xf32>
      %c0_11 = arith.constant 0 : index
      %c0_12 = arith.constant 0 : index
      %13 = vector.load %arg7[%c0_11, %c0_12] : memref<32x192xf32, #tpu.memory_space<vmem>>, vector<32x192xf32>
      tpu.vector_store %arg7[%c0_11, %c0_12], %12 {strides = array<i32>} : memref<32x192xf32, #tpu.memory_space<vmem>>, vector<32x192xf32>,
    } else {
    }
    %c0 = arith.constant 0 : index
    %c0_1 = arith.constant 0 : index
    %3 = vector.load %arg7[%c0, %c0_1] : memref<32x192xf32, #tpu.memory_space<vmem>>, vector<32x192xf32>
    %c0_2 = arith.constant 0 : index
    %c0_3 = arith.constant 0 : index
    %4 = vector.load %arg3[%c0_2, %c0_3] : memref<32x64xf32, #tpu.memory_space<vmem>>, vector<32x64xf32>
    %c0_4 = arith.constant 0 : index
    %c0_5 = arith.constant 0 : index
    %5 = vector.load %arg4[%c0_4, %c0_5] : memref<64x192xf32, #tpu.memory_space<vmem>>, vector<64x192xf32>
    %cst = arith.constant dense<0.000000e+00> : vector<32x192xf32>
    %6 = tpu.matmul %4, %5, %cst {dimension_numbers = #tpu.dot_dimension_numbers<[1], [0], [0], [1], [0, 0, 1, 1], [], []>} : vector<32x64xf32>, vector<64x192xf32>, vector<32x192xf32> -> vector<32x192xf32>
    %7 = arith.addf %3, %6 : vector<32x192xf32>
    %c0_6 = arith.constant 0 : index
    %c0_7 = arith.constant 0 : index
    %8 = vector.load %arg7[%c0_6, %c0_7] : memref<32x192xf32, #tpu.memory_space<vmem>>, vector<32x192xf32>
    tpu.vector_store %arg7[%c0_6, %c0_7], %7 {strides = array<i32>} : memref<32x192xf32, #tpu.memory_space<vmem>>, vector<32x192xf32>,
    %c0_i32_8 = arith.constant 0 : i32
    %9 = arith.cmpi eq, %arg2, %c0_i32_8 : i32
    %10 = arith.extui %9 : i1 to i32
    %c0_i32_9 = arith.constant 0 : i32
    %11 = arith.cmpi ne, %10, %c0_i32_9 : i32
    scf.if %11 {
      %c0_10 = arith.constant 0 : index
      %c0_11 = arith.constant 0 : index
      %12 = vector.load %arg7[%c0_10, %c0_11] : memref<32x192xf32, #tpu.memory_space<vmem>>, vector<32x192xf32>
      %c0_12 = arith.constant 0 : index
      %c0_13 = arith.constant 0 : index
      %13 = vector.load %arg5[%c0_12, %c0_13] : memref<1x192xf32, #tpu.memory_space<vmem>>, vector<1x192xf32>
      %14 = vector.broadcast %13 : vector<1x192xf32> to vector<32x192xf32>
      %15 = arith.addf %12, %14 : vector<32x192xf32>
      %c0_14 = arith.constant 0 : index
      %c0_15 = arith.constant 0 : index
      %16 = vector.load %arg6[%c0_14, %c0_15] : memref<32x192xf32, #tpu.memory_space<vmem>>, vector<32x192xf32>
      tpu.vector_store %arg6[%c0_14, %c0_15], %15 {strides = array<i32>} : memref<32x192xf32, #tpu.memory_space<vmem>>, vector<32x192xf32>,
    } else {
    }
    return
  }
  func.func @transform_0(%arg0: i32, %arg1: i32, %arg2: i32) -> (i32, i32) {
    %c0_i32 = arith.constant 0 : i32
    return %arg0, %arg2 : i32, i32
  }
  func.func @transform_1(%arg0: i32, %arg1: i32, %arg2: i32) -> (i32, i32) {
    %c0_i32 = arith.constant 0 : i32
    return %arg2, %arg1 : i32, i32
  }
  func.func @transform_2(%arg0: i32, %arg1: i32, %arg2: i32) -> (i32, i32) {
    %c0_i32 = arith.constant 0 : i32
    %c0_i32_0 = arith.constant 0 : i32
    return %c0_i32, %arg1 : i32, i32
  }
  func.func @transform_3(%arg0: i32, %arg1: i32, %arg2: i32) -> (i32, i32) {
    %c0_i32 = arith.constant 0 : i32
    return %arg0, %arg1 : i32, i32
  }
}

</mosaic_0001>

<bundles_post_ra>
// kernel: tpu_custom_call.1
= control target key start
LH: loop header
LB: loop body
LE: loop exit
PB: predicated region body
PF: predicated region fallthrough
CT: control target
= control target key end

     0   :  { %8 = vsyncpa [#allocation4], 0  ;;  %s443_s0 = inlined_call_operand.hbm [shape: f32[32,64], index: 0, kind: input, shape index: {}]   ;;  %s444_s1 = inlined_call_operand.hbm [shape: f32[64,192], index: 1, kind: input, shape index: {}]   ;;  %s445_s2 = inlined_call_operand.hbm [shape: f32[1,192], index: 2, kind: input, shape index: {}]   ;;  %s446_s3 = inlined_call_operand.hbm [shape: f32[32,192], index: 3, kind: output, shape index: {}]  }
   0x1   :  { %9 = vsyncpa [#allocation7], 0  ;;  %s28_s14 = sshll.u32 %s444_s1, 4  ;;  %s29_s14 = int_to_ptr.hbm [resolvable:$true] %s28_s14 }
   0x2   :  { %10 = vsyncpa [#allocation5], 0  ;;  %s376_s15 = smov [#allocation6]   ;;  %s15_s19 = sshll.u32 %s443_s0, 4  ;;  %s16_s19 = int_to_ptr.hbm [resolvable:$true] %s15_s19 }
   0x3   :  { %s30_s16 = sshll.u32 %s376_s15, 4  ;;  %s377_s20 = smov 256   ;;  %s31_s16 = int_to_ptr.vmem [resolvable:$true] %s30_s16 }
   0x4   :  { %s378_s21 = smov 16   ;;  %s379_s22 = smov [#allocation3]  }
   0x5   :  { %36 = dma.hbm_to_vmem [thread:$0]  %s29_s14, 2048, %s31_s16, [#allocation7], %s377_s20, %s377_s20, %s378_s21  }
   0x6   :  { %s17_s23 = sshll.u32 %s379_s22, 4  ;;  %s380_s1 = smov 128   ;;  %s18_s23 = int_to_ptr.vmem [resolvable:$true] %s17_s23 }
   0x7   :  { %s381_s24 = smov 8   ;;  %s42_s27 = sshll.u32 %s445_s2, 4  ;;  %s43_s27 = int_to_ptr.hbm [resolvable:$true] %s42_s27 }
   0x8   :  { %23 = dma.hbm_to_vmem [thread:$0]  %s16_s19, 512, %s18_s23, [#allocation4], %s380_s1, %s380_s1, %s381_s24  }
   0x9   :  { %s382_s28 = smov [#allocation8]  }
   0xa   :  { %s44_s0 = sshll.u32 %s382_s28, 4  ;;  %s45_s0 = int_to_ptr.vmem [resolvable:$true] %s44_s0 }
   0xb   :  { %47 = dma.hbm_to_vmem [thread:$0]  %s43_s27, 32, %s45_s0, [#allocation7]  }
   0xc   :  { %370 = dma.done.wait [#allocation4], 512  }
   0xd   :  { %371 = vsyncadd [#allocation4], 4294966784 }
   0xe   :  { %372 = dma.done.wait [#allocation7], 2080  }
   0xf   :  { %373 = vsyncadd [#allocation7], 4294965216  ;;  %vm65_vm0 = vcmask 523264   ;;  %v383_v0 = vmov 0.0   ;;  %v99_v1 = vld [vmem:[#allocation6 + $0x70] sm:$0xff]  ;;  %v100_v2 = vld [vmem:[#allocation6 + $0x78] sm:$0xff] }
  0x10   :  { %66 = vst.msk [vmem:[#allocation2 + $0x8] sm:$0xff] %vm65_vm0, %v383_v0  ;;  %v97_v3 = vld [vmem:[#allocation6 + $0x60] sm:$0xff]  ;;  %249 = vmatpush.msra.mxu2 %v99_v1  ;;  %257 = vmatpush.msra.mxu3 %v100_v2  ;;  %v98_v4 = vld [vmem:[#allocation6 + $0x68] sm:$0xff]  ;;  %v95_v5 = vld [vmem:[#allocation6 + $0x50] sm:$0xff]  ;;  %s384_s2 = smov [#allocation9]   ;;  %s227_s5 = sshll.u32 %s446_s3, 4  ;;  %s228_s5 = int_to_ptr.hbm [resolvable:$true] %s227_s5 }
  0x11   :  { %68 = vst.msk [vmem:[#allocation2 + $0x18] sm:$0xff] %vm65_vm0, %v383_v0  ;;  %v96_v6 = vld [vmem:[#allocation6 + $0x58] sm:$0xff]  ;;  %122 = vmatpush.msra.mxu0 %v99_v1  ;;  %151 = vmatpush.msra.mxu1 %v100_v2  ;;  %v93_v7 = vld [vmem:[#allocation6 + $0x40] sm:$0xff]  ;;  %v94_v8 = vld [vmem:[#allocation6 + $0x48] sm:$0xff]  ;;  %s225_s29 = sshll.u32 %s384_s2, 4  ;;  %s226_s29 = int_to_ptr.vmem [resolvable:$true] %s225_s29 }
  0x12   :  { %70 = vst.msk [vmem:[#allocation2 + $0x28] sm:$0xff] %vm65_vm0, %v383_v0  ;;  %250 = vmatpush.msra.mxu2 %v97_v3  ;;  %258 = vmatpush.msra.mxu3 %v98_v4  ;;  %v91_v9 = vld [vmem:[#allocation6 + $0x30] sm:$0xff]  ;;  %v92_v10 = vld [vmem:[#allocation6 + $0x38] sm:$0xff]  ;;  %v89_v11 = vld [vmem:[#allocation6 + $0x20] sm:$0xff] }
  0x13   :  { %72 = vst.msk [vmem:[#allocation2 + $0x38] sm:$0xff] %vm65_vm0, %v383_v0  ;;  %123 = vmatpush.msra.mxu0 %v97_v3  ;;  %152 = vmatpush.msra.mxu1 %v98_v4  ;;  %v90_v12 = vld [vmem:[#allocation6 + $0x28] sm:$0xff]  ;;  %v87_v13 = vld [vmem:[#allocation6 + $0x10] sm:$0xff]  ;;  %v88_v14 = vld [vmem:[#allocation6 + $0x18] sm:$0xff] }
  0x14   :  { %251 = vmatpush.msra.mxu2 %v95_v5  ;;  %259 = vmatpush.msra.mxu3 %v96_v6  ;;  %v85_v15 = vld [vmem:[#allocation6] sm:$0xff]  ;;  %v86_v16 = vld [vmem:[#allocation6 + $0x8] sm:$0xff]  ;;  %v83_v17 = vld [vmem:[#allocation3 + $0x10] sm:$0xff] }
  0x15   :  { %124 = vmatpush.msra.mxu0 %v95_v5  ;;  %153 = vmatpush.msra.mxu1 %v96_v6  ;;  %v81_v18 = vld [vmem:[#allocation3] sm:$0xff]  ;;  %v84_v19 = vld [vmem:[#allocation3 + $0x18] sm:$0xff]  ;;  %v82_v20 = vld [vmem:[#allocation3 + $0x8] sm:$0xff] }
  0x16   :  { %252 = vmatpush.msra.mxu2 %v93_v7  ;;  %260 = vmatpush.msra.mxu3 %v94_v8  ;;  %v199_v21 = vld [vmem:[#allocation8] sm:$0x3] }
  0x17   :  { %125 = vmatpush.msra.mxu0 %v93_v7  ;;  %154 = vmatpush.msra.mxu1 %v94_v8  ;;  %v74_v22 = vld [vmem:[#allocation2 + $0x8] sm:$0xff]  ;;  %v201_v23 = vperm.slane %v199_v21, 0  ;;  %v202_v36 = vperm.slane %v199_v21, 1 }
  0x18   :  { %253 = vmatpush.msra.mxu2 %v91_v9  ;;  %261 = vmatpush.msra.mxu3 %v92_v10  ;;  %v76_v32 = vld [vmem:[#allocation2 + $0x18] sm:$0xff] }
  0x19   :  { %126 = vmatpush.msra.mxu0 %v91_v9  ;;  %155 = vmatpush.msra.mxu1 %v92_v10  ;;  %v78_v27 = vld [vmem:[#allocation2 + $0x28] sm:$0xff] }
  0x1a   :  { %254 = vmatpush.msra.mxu2 %v89_v11  ;;  %262 = vmatpush.msra.mxu3 %v90_v12  ;;  %v80_v38 = vld [vmem:[#allocation2 + $0x38] sm:$0xff] }
  0x1b   :  { %127 = vmatpush.msra.mxu0 %v89_v11  ;;  %156 = vmatpush.msra.mxu1 %v90_v12 }
  0x1c   :  { %255 = vmatpush.msra.mxu2 %v87_v13  ;;  %263 = vmatpush.msra.mxu3 %v88_v14 }
  0x1d   :  { %128 = vmatpush.msra.mxu0 %v87_v13  ;;  %157 = vmatpush.msra.mxu1 %v88_v14 }
  0x1e   :  { %256 = vmatpush.msra.mxu2 %v85_v15  ;;  %264 = vmatpush.msra.mxu3 %v86_v16 }
  0x1f   :  { %243 = vmatmul.msk.f32.vlgmr.msra.gmra.mxu2 %vm65_vm0, %v83_v17  ;;  %247 = vmatmul.msk.f32.vlgmr.msra.gmra.mxu3 %vm65_vm0, %v83_v17 }
  0x20   :  { %129 = vmatpush.msra.mxu0 %v85_v15  ;;  %158 = vmatpush.msra.mxu1 %v86_v16 }
  0x21   :  { %241 = vmatmul.msk.f32.vlgmr.msra.gmra.mxu0 %vm65_vm0, %v81_v18  ;;  %245 = vmatmul.msk.f32.vlgmr.msra.gmra.mxu1 %vm65_vm0, %v81_v18 }
  0x27   :  { %244 = vmatmul.msk.f32.gmra.mxu2 %vm65_vm0, %v84_v19  ;;  %248 = vmatmul.msk.f32.gmra.mxu3 %vm65_vm0, %v84_v19 }
  0x29   :  { %242 = vmatmul.msk.f32.gmra.mxu0 %vm65_vm0, %v82_v20  ;;  %246 = vmatmul.msk.f32.gmra.mxu1 %vm65_vm0, %v82_v20 }
  0x9e   :  { %v131_v24 = vpop.f32.mrf.mxu0  ;;  %v160_v25 = vpop.f32.mrf.mxu1 }
  0x9f   :  { %v173_v26 = vadd.f32 %v160_v25, %v74_v22  ;;  %v205_v28 = vadd.f32 %v201_v23, %v131_v24 }
  0xa1   :  { %181 = vst.msk [vmem:[#allocation2 + $0x8] sm:$0xff] %vm65_vm0, %v173_v26 }
  0xa2   :  { %v137_v29 = vpop.f32.mrf.mxu2  ;;  %v166_v30 = vpop.f32.mrf.mxu3  ;;  %213 = vst [vmem:[#allocation9] sm:$0xff] %v205_v28 }
  0xa3   :  { %v177_v31 = vadd.f32 %v166_v30, %v78_v27  ;;  %v209_v33 = vadd.f32 %v201_v23, %v137_v29 }
  0xa5   :  { %185 = vst.msk [vmem:[#allocation2 + $0x28] sm:$0xff] %vm65_vm0, %v177_v31 }
  0xa6   :  { %v134_v34 = vpop.f32.mrf.mxu0  ;;  %v163_v35 = vpop.f32.mrf.mxu1  ;;  %217 = vst [vmem:[#allocation9 + $0x20] sm:$0xff] %v209_v33 }
  0xa7   :  { %v175_v37 = vadd.f32 %v163_v35, %v76_v32  ;;  %v207_v40 = vadd.f32 %v201_v23, %v134_v34 }
  0xa8   :  { %v192_v39 = vld [vmem:[#allocation2 + $0x8] sm:$0xff] }
  0xa9   :  { %183 = vst.msk [vmem:[#allocation2 + $0x18] sm:$0xff] %vm65_vm0, %v175_v37  ;;  %v206_v43 = vadd.f32 %v202_v36, %v192_v39 }
  0xaa   :  { %v140_v41 = vpop.f32.mrf.mxu2  ;;  %v169_v42 = vpop.f32.mrf.mxu3  ;;  %215 = vst [vmem:[#allocation9 + $0x10] sm:$0xff] %v207_v40 }
  0xab   :  { %v179_v44 = vadd.f32 %v169_v42, %v80_v38  ;;  %214 = vst.msk [vmem:[#allocation9 + $0x8] sm:$0xff] %vm65_vm0, %v206_v43  ;;  %v211_v46 = vadd.f32 %v201_v23, %v140_v41 }
  0xac   :  { %v196_v45 = vld [vmem:[#allocation2 + $0x28] sm:$0xff] }
  0xad   :  { %187 = vst.msk [vmem:[#allocation2 + $0x38] sm:$0xff] %vm65_vm0, %v179_v44  ;;  %v210_v47 = vadd.f32 %v202_v36, %v196_v45 }
  0xae   :  { %219 = vst [vmem:[#allocation9 + $0x30] sm:$0xff] %v211_v46 }
  0xaf   :  { %218 = vst.msk [vmem:[#allocation9 + $0x28] sm:$0xff] %vm65_vm0, %v210_v47 }
  0xb0   :  { %v194_v48 = vld [vmem:[#allocation2 + $0x18] sm:$0xff] }
  0xb1   :  { %v208_v49 = vadd.f32 %v202_v36, %v194_v48 }
  0xb3   :  { %216 = vst.msk [vmem:[#allocation9 + $0x18] sm:$0xff] %vm65_vm0, %v208_v49 }
  0xb4   :  { %v198_v50 = vld [vmem:[#allocation2 + $0x38] sm:$0xff] }
  0xb5   :  { %v212_v51 = vadd.f32 %v202_v36, %v198_v50 }
  0xb7   :  { %220 = vst.msk [vmem:[#allocation9 + $0x38] sm:$0xff] %vm65_vm0, %v212_v51 }
  0xb8   :  { %233 = dma.vmem_to_hbm [thread:$0]  %s226_s29, 1024, %s228_s5, [#allocation5], %s377_s20, %s377_s20, %s378_s21  }
  0xb9   :  { %374 = dma.done.wait [#allocation5], 1024  }
  0xba   :  { %375 = vsyncadd [#allocation5], 4294966272 }
  0xbb   :  { %238 = vsyncpa [#allocation4], 1 }
  0xbc   :  { %239 = vsyncpa [#allocation7], 1 }
  0xbd   :  { %240 = vsyncpa [#allocation5], 1 }

</bundles_post_ra>
